<compile_context>
chip_gen: v7x
topology: tpu7x:2x2x1
jax: 0.10.0
libtpu: 0.0.40
codegen_flags: <defaults>
</compile_context>

<pallas_src>
import functools
import math

import jax
import jax.numpy as jnp
from jax.experimental import pallas as pl
from jax.experimental.pallas import tpu as pltpu

# Finite mask value for padded class columns (avoids inf-inf NaN hazards):
# padded logits never win the row max and contribute exp(.) == 0 to the sum.
_NEG_LARGE = -1e30


def _round_up(x, m):
    return ((x + m - 1) // m) * m


def _vmem_capacity_bytes():
    try:
        return int(pltpu.get_tpu_info().vmem_capacity_bytes)
    except Exception:
        return 64 * 1024 * 1024  # conservative: v7x per-TensorCore VMEM


def _choose_tiles(B, F, C_pad, x_itemsize, w_itemsize, out_itemsize, budget):
    """Pick (batch tile, feature tile, #K steps, est. VMEM bytes)."""
    # Reduction (feature) tile: split K only when the resident weight tile is
    # large.  Ragged K tiles are NOT allowed (out-of-bounds garbage would be
    # accumulated into valid rows), so TK must divide F exactly.
    tk = F
    if F * C_pad * w_itemsize > budget // 2:
        for cand in (2048, 1024, 512, 256, 128):
            if F % cand == 0:
                tk = cand
                break
    k_steps = F // tk

    # Batch tile: biggest that fits the budget, capped at 512 (v5e/v6e sweet
    # spot), min 8, and >= 2 grid steps when B allows (v7x megacore).
    tb = min(512, _round_up(B, 8))
    if B > 8:
        tb = min(tb, _round_up(pl.cdiv(B, 2), 8))

    def vmem_bytes(t):
        w_bufs = 1 if k_steps == 1 else 2            # resident vs double-buffered
        return (2 * t * tk * x_itemsize              # x tiles (double-buffered)
                + w_bufs * tk * C_pad * w_itemsize   # weight
                + C_pad * 4                          # bias (resident, f32)
                + 2 * t * C_pad * out_itemsize       # output tiles
                + t * C_pad * 4                      # f32 accumulator scratch
                + 3 * t * C_pad * 4)                 # f32 log_softmax temporaries

    while tb > 8 and vmem_bytes(tb) > budget:
        tb = max(8, _round_up(tb // 2, 8))
    return tb, tk, k_steps, vmem_bytes(tb)


def _linear_logsoftmax_kernel(x_ref, w_ref, b_ref, o_ref, acc_ref):
    k = pl.program_id(1)

    @pl.when(k == 0)
    def _():
        acc_ref[...] = jnp.zeros_like(acc_ref)

    # MXU matmul on its fast (bf16) path; f32 accumulation in VMEM scratch.
    acc_ref[...] += jnp.dot(
        x_ref[...].astype(w_ref.dtype), w_ref[...],
        preferred_element_type=jnp.float32)

    @pl.when(k == pl.num_programs(1) - 1)
    def _():
        # Padded class columns carry a -1e30 bias, so they never affect the
        # max or the sum(exp).  All softmax math stays in f32 (VPU/EUP).
        logits = acc_ref[...] + b_ref[...]                     # (TB, C_pad) f32
        m = jnp.max(logits, axis=-1, keepdims=True)
        shifted = logits - m
        lse = jnp.log(jnp.sum(jnp.exp(shifted), axis=-1, keepdims=True))
        o_ref[...] = (shifted - lse).astype(o_ref.dtype)


def prepare_params(weight, bias, *, mxu_dtype=jnp.bfloat16):
    """One-time packing of nn.Linear params (call OUTSIDE the step loop).

    weight: (C, F), bias: (C,) ->
      w_t: (F, C_pad) in mxu_dtype (transposed, class-padded with zeros),
      b_p: (1, C_pad) f32 (padded columns = -1e30).
    """
    C, F = weight.shape
    # Lane-dense class dim; 256-multiple when C is large enough that a
    # half-filled last MXU N tile matters (v6e/v7x 256-wide MXU).
    C_pad = _round_up(C, 256) if C >= 2048 else _round_up(C, 128)
    w_t = jnp.pad(weight.T.astype(mxu_dtype), ((0, 0), (0, C_pad - C)))
    b_p = jnp.pad(bias.astype(jnp.float32).reshape(1, C),
                  ((0, 0), (0, C_pad - C)), constant_values=_NEG_LARGE)
    return w_t, b_p


@functools.partial(jax.jit, static_argnames=("n_classes", "out_dtype"))
def linear_classifier_forward(x, w_t, b_p, *, n_classes, out_dtype=jnp.float32):
    """x: (B, F); w_t/b_p from prepare_params -> (B, n_classes) log-probs.

    out_dtype=jnp.bfloat16 halves the output DMA + the final slice copy if the
    caller tolerates it.
    """
    B, F = x.shape
    Fw, C_pad = w_t.shape
    assert Fw == F, "weight/input feature mismatch"

    x_itemsize = jnp.dtype(x.dtype).itemsize
    w_itemsize = jnp.dtype(w_t.dtype).itemsize
    out_itemsize = jnp.dtype(out_dtype).itemsize

    capacity = _vmem_capacity_bytes()
    budget = (2 * capacity) // 5                       # ~40% of physical VMEM
    TB, TK, K_steps, vmem_need = _choose_tiles(
        B, F, C_pad, x_itemsize, w_itemsize, out_itemsize, budget)

    grid = (pl.cdiv(B, TB), K_steps)

    # Invariant weight/bias -> whole-array VMEM residency (single buffer, one
    # up-front DMA).  When the reduction axis is tiled, the weight is streamed
    # (double-buffered) along K instead.
    if K_steps == 1:
        w_spec = pl.BlockSpec(memory_space=pltpu.MemorySpace.VMEM)
    else:
        w_spec = pl.BlockSpec((TK, C_pad), lambda i, k: (k, 0))
    b_spec = pl.BlockSpec(memory_space=pltpu.MemorySpace.VMEM)

    cost = pl.CostEstimate(
        flops=2 * B * F * C_pad,
        transcendentals=B * C_pad,
        bytes_accessed=(x_itemsize * B * F + w_itemsize * F * C_pad
                        + 4 * C_pad + out_itemsize * B * C_pad),
    )
    compiler_params = pltpu.CompilerParams(
        # Independent batch tiles -> shard across TensorCores on v7x; the K
        # axis revisits the same output block -> arbitrary.
        dimension_semantics=("parallel", "arbitrary"),
        # Explicit scoped-VMEM limit: legal on v5e's 16 MiB default, bounded
        # well inside v7x's 64 MiB physical VMEM.
        vmem_limit_bytes=int(min(max(vmem_need + (4 << 20), 32 << 20),
                                 (capacity * 3) // 4)),
    )

    out_padded = pl.pallas_call(
        _linear_logsoftmax_kernel,
        out_shape=jax.ShapeDtypeStruct((B, C_pad), out_dtype),
        grid_spec=pltpu.PrefetchScalarGridSpec(
            num_scalar_prefetch=0,
            grid=grid,
            in_specs=[
                pl.BlockSpec((TB, TK), lambda i, k: (i, k)),   # streamed x tiles
                w_spec,
                b_spec,
            ],
            out_specs=pl.BlockSpec((TB, C_pad), lambda i, k: (i, 0)),
            scratch_shapes=[pltpu.VMEM((TB, C_pad), jnp.float32)],
        ),
        compiler_params=compiler_params,
        cost_estimate=cost,
    )(x, w_t, b_p)

    # Drop class padding outside the kernel (lane-dense, unmasked stores inside).
    return out_padded[:, :n_classes]


def init_linear_params(key, in_features, n_classes):
    # Mirrors torch.nn.Linear default init: U(-1/sqrt(fan_in), 1/sqrt(fan_in)).
    kw, kb = jax.random.split(key)
    bound = 1.0 / math.sqrt(in_features)
    weight = jax.random.uniform(
        kw, (n_classes, in_features), jnp.float32, -bound, bound)
    bias = jax.random.uniform(kb, (n_classes,), jnp.float32, -bound, bound)
    return weight, bias


if __name__ == "__main__":
    in_features = 32
    n_classes = 10
    batch = 8

    key = jax.random.PRNGKey(0)
    kx, kp = jax.random.split(key)
    x = jax.random.normal(kx, (batch, in_features), jnp.float32)
    weight, bias = init_linear_params(kp, in_features, n_classes)

    # One-time param packing (transpose + class pad + bf16 cast), then the
    # jitted forward — no per-call weight copies, no batch pad of x.
    w_t, b_p = prepare_params(weight, bias)
    out = linear_classifier_forward(x, w_t, b_p, n_classes=n_classes)
    out = jax.block_until_ready(out)
    assert out.shape == (batch, n_classes)

    # Reference with matching bf16 MXU feed (f32 accumulation): tight check.
    ref_bf16 = jax.nn.log_softmax(
        jnp.dot(x.astype(jnp.bfloat16), weight.T.astype(jnp.bfloat16),
                preferred_element_type=jnp.float32) + bias, axis=1)
    assert jnp.allclose(out, ref_bf16, atol=1e-4, rtol=1e-4), \
        "mismatch vs bf16-matched reference"

    # Full-f32 reference: loose check (bf16 MXU feed is the only delta).
    ref_f32 = jax.nn.log_softmax(x @ weight.T + bias, axis=1)
    assert jnp.allclose(out, ref_f32, atol=5e-2, rtol=0), \
        "mismatch vs f32 reference"

    print("KERNEL_OK")
</pallas_src>

<mosaic_0001>
module attributes {stable_mosaic.version = 11 : i64} {
  func.func @_linear_logsoftmax_kernel(%arg0: i32, %arg1: i32, %arg2: memref<8x32xf32, #tpu.memory_space<vmem>>, %arg3: memref<32x128xbf16, #tpu.memory_space<vmem>>, %arg4: memref<1x128xf32, #tpu.memory_space<vmem>>, %arg5: memref<8x128xf32, #tpu.memory_space<vmem>>, %arg6: memref<8x128xf32, #tpu.memory_space<vmem>>) attributes {dimension_semantics = [#tpu.dimension_semantics<parallel>, #tpu.dimension_semantics<arbitrary>], iteration_bounds = array<i64: 1, 1>, scalar_prefetch = 0 : i64, scratch_operands = 1 : i64, tpu.core_type = #tpu.core_type<tc>, window_params = [{transform_indices = @transform_0, window_bounds = array<i64: 8, 32>}, {pipeline_mode = #tpu.pipeline_mode<synchronous>, transform_indices = @transform_1, window_bounds = array<i64: 32, 128>}, {pipeline_mode = #tpu.pipeline_mode<synchronous>, transform_indices = @transform_2, window_bounds = array<i64: 1, 128>}, {transform_indices = @transform_3, window_bounds = array<i64: 8, 128>}]} {
    %c0_i32 = arith.constant 0 : i32
    %0 = arith.cmpi eq, %arg1, %c0_i32 : i32
    %1 = arith.extui %0 : i1 to i32
    %c0_i32_0 = arith.constant 0 : i32
    %2 = arith.cmpi ne, %1, %c0_i32_0 : i32
    scf.if %2 {
      %cst_10 = arith.constant 0.000000e+00 : f32
      %13 = vector.broadcast %cst_10 : f32 to vector<8x128xf32>
      %c0_11 = arith.constant 0 : index
      %c0_12 = arith.constant 0 : index
      %14 = vector.load %arg6[%c0_11, %c0_12] : memref<8x128xf32, #tpu.memory_space<vmem>>, vector<8x128xf32>
      tpu.vector_store %arg6[%c0_11, %c0_12], %13 {strides = array<i32>} : memref<8x128xf32, #tpu.memory_space<vmem>>, vector<8x128xf32>,
    } else {
    }
    %c0 = arith.constant 0 : index
    %c0_1 = arith.constant 0 : index
    %3 = vector.load %arg6[%c0, %c0_1] : memref<8x128xf32, #tpu.memory_space<vmem>>, vector<8x128xf32>
    %c0_2 = arith.constant 0 : index
    %c0_3 = arith.constant 0 : index
    %4 = vector.load %arg2[%c0_2, %c0_3] : memref<8x32xf32, #tpu.memory_space<vmem>>, vector<8x32xf32>
    %5 = arith.truncf %4 : vector<8x32xf32> to vector<8x32xbf16>
    %c0_4 = arith.constant 0 : index
    %c0_5 = arith.constant 0 : index
    %6 = vector.load %arg3[%c0_4, %c0_5] : memref<32x128xbf16, #tpu.memory_space<vmem>>, vector<32x128xbf16>
    %cst = arith.constant dense<0.000000e+00> : vector<8x128xf32>
    %7 = tpu.matmul %5, %6, %cst {dimension_numbers = #tpu.dot_dimension_numbers<[1], [0], [0], [1], [0, 0, 1, 1], [], []>} : vector<8x32xbf16>, vector<32x128xbf16>, vector<8x128xf32> -> vector<8x128xf32>
    %8 = arith.addf %3, %7 : vector<8x128xf32>
    %c0_6 = arith.constant 0 : index
    %c0_7 = arith.constant 0 : index
    %9 = vector.load %arg6[%c0_6, %c0_7] : memref<8x128xf32, #tpu.memory_space<vmem>>, vector<8x128xf32>
    tpu.vector_store %arg6[%c0_6, %c0_7], %8 {strides = array<i32>} : memref<8x128xf32, #tpu.memory_space<vmem>>, vector<8x128xf32>,
    %c0_i32_8 = arith.constant 0 : i32
    %10 = arith.cmpi eq, %arg1, %c0_i32_8 : i32
    %11 = arith.extui %10 : i1 to i32
    %c0_i32_9 = arith.constant 0 : i32
    %12 = arith.cmpi ne, %11, %c0_i32_9 : i32
    scf.if %12 {
      %c0_10 = arith.constant 0 : index
      %c0_11 = arith.constant 0 : index
      %13 = vector.load %arg6[%c0_10, %c0_11] : memref<8x128xf32, #tpu.memory_space<vmem>>, vector<8x128xf32>
      %c0_12 = arith.constant 0 : index
      %c0_13 = arith.constant 0 : index
      %14 = vector.load %arg4[%c0_12, %c0_13] : memref<1x128xf32, #tpu.memory_space<vmem>>, vector<1x128xf32>
      %15 = vector.broadcast %14 : vector<1x128xf32> to vector<8x128xf32>
      %16 = arith.addf %13, %15 : vector<8x128xf32>
      %cst_14 = arith.constant dense<0xFF800000> : vector<8xf32>
      %17 = vector.multi_reduction <maximumf>, %16, %cst_14 [1] : vector<8x128xf32> to vector<8xf32>
      %18 = vector.shape_cast %17 : vector<8xf32> to vector<8x1xf32>
      %19 = vector.broadcast %18 : vector<8x1xf32> to vector<8x128xf32>
      %20 = arith.subf %16, %19 : vector<8x128xf32>
      %21 = math.exp %20 : vector<8x128xf32>
      %cst_15 = arith.constant dense<0.000000e+00> : vector<8xf32>
      %22 = vector.multi_reduction <add>, %21, %cst_15 [1] : vector<8x128xf32> to vector<8xf32>
      %23 = vector.shape_cast %22 : vector<8xf32> to vector<8x1xf32>
      %24 = math.log %23 : vector<8x1xf32>
      %25 = vector.broadcast %24 : vector<8x1xf32> to vector<8x128xf32>
      %26 = arith.subf %20, %25 : vector<8x128xf32>
      %c0_16 = arith.constant 0 : index
      %c0_17 = arith.constant 0 : index
      %27 = vector.load %arg5[%c0_16, %c0_17] : memref<8x128xf32, #tpu.memory_space<vmem>>, vector<8x128xf32>
      tpu.vector_store %arg5[%c0_16, %c0_17], %26 {strides = array<i32>} : memref<8x128xf32, #tpu.memory_space<vmem>>, vector<8x128xf32>,
    } else {
    }
    return
  }
  func.func @transform_0(%arg0: i32, %arg1: i32) -> (i32, i32) {
    %c0_i32 = arith.constant 0 : i32
    return %arg0, %arg1 : i32, i32
  }
  func.func @transform_1(%arg0: i32, %arg1: i32) -> (i32, i32) {
    %c0_i32 = arith.constant 0 : i32
    %c0_i32_0 = arith.constant 0 : i32
    %c0_i32_1 = arith.constant 0 : i32
    return %c0_i32, %c0_i32_0 : i32, i32
  }
  func.func @transform_2(%arg0: i32, %arg1: i32) -> (i32, i32) {
    %c0_i32 = arith.constant 0 : i32
    %c0_i32_0 = arith.constant 0 : i32
    %c0_i32_1 = arith.constant 0 : i32
    return %c0_i32, %c0_i32_0 : i32, i32
  }
  func.func @transform_3(%arg0: i32, %arg1: i32) -> (i32, i32) {
    %c0_i32 = arith.constant 0 : i32
    %c0_i32_0 = arith.constant 0 : i32
    return %arg0, %c0_i32 : i32, i32
  }
}

</mosaic_0001>

<bundles_post_ra>
// kernel: linear_classifier_forward.1
= control target key start
LH: loop header
LB: loop body
LE: loop exit
PB: predicated region body
PF: predicated region fallthrough
CT: control target
= control target key end

     0   :  { %8 = vsyncpa [#allocation4], 0  ;;  %s324_s0 = inlined_call_operand.hbm [shape: f32[8,32], index: 0, kind: input, shape index: {}]   ;;  %s325_s1 = inlined_call_operand.hbm [shape: bf16[32,128], index: 1, kind: input, shape index: {}]   ;;  %s326_s2 = inlined_call_operand.vmem [shape: f32[1,128], index: 2, kind: input, shape index: {}]   ;;  %s327_s3 = inlined_call_operand.hbm [shape: f32[8,128], index: 3, kind: output, shape index: {}]  }
   0x1   :  { %9 = vsyncpa [#allocation7], 0 }
   0x2   :  { %10 = vsyncpa [#allocation5], 0  ;;  %s251_s12 = smov [#allocation3]   ;;  %s252_s14 = smov [#allocation6]  }
   0x3   :  { %s17_s13 = sshll.u32 %s251_s12, 4  ;;  %s26_s15 = sshll.u32 %s252_s14, 4  ;;  %s18_s13 = int_to_ptr.vmem [resolvable:$true] %s17_s13  ;;  %s278_s15 = int_to_ptr.vmem [resolvable:$true] %s26_s15 }
   0x4   :  { %s179_s18 = scalar_lea.hbm %s324_s0, 128 }
   0x5   :  { %p180_p0 = scmp.ne.s32.totalorder %s324_s0, %s179_s18  ;;  %p183_p1 = scmp.lt.u32.totalorder %s179_s18, %s324_s0 }
   0x7   :  { %p185_p2 = pnand %p183_p1, %p180_p0 }
   0x9   :  { %188 = shalt.err (!%p185_p2)
}
   0xa   :  { %s189_s23 = scalar_lea.vmem %s18_s13, 128  ;;  %p194_p4 = scmp.lt.s32.totalorder %s18_s13, %s18_s13 }
   0xb   :  { %p190_p3 = scmp.ne.s32.totalorder %s18_s13, %s189_s23  ;;  %p195_p5 = scmp.lt.s32.totalorder %s189_s23, %s189_s23 }
   0xd   :  { %p196_p6 = por %p195_p5, %p194_p4 }
   0xf   :  { %p197_p7 = pnand %p196_p6, %p190_p3 }
  0x11   :  { %200 = shalt.err (!%p197_p7)
}
  0x12   :  { %20 = dma.hbm_to_vmem [thread:$0]  %s324_s0, 128, %s18_s13, [#allocation4]  }
  0x13   :  { %s201_s28 = scalar_lea.hbm %s325_s1, 256 }
  0x14   :  { %p202_p8 = scmp.ne.s32.totalorder %s325_s1, %s201_s28  ;;  %p205_p9 = scmp.lt.u32.totalorder %s201_s28, %s325_s1 }
  0x16   :  { %p207_p10 = pnand %p205_p9, %p202_p8 }
  0x18   :  { %210 = shalt.err (!%p207_p10)
}
  0x19   :  { %s211_s6 = scalar_lea.vmem %s278_s15, 256  ;;  %p216_p12 = scmp.lt.s32.totalorder %s278_s15, %s278_s15 }
  0x1a   :  { %p212_p11 = scmp.ne.s32.totalorder %s278_s15, %s211_s6  ;;  %p217_p13 = scmp.lt.s32.totalorder %s211_s6, %s211_s6 }
  0x1c   :  { %p218_p0 = por %p217_p13, %p216_p12 }
  0x1e   :  { %p219_p1 = pnand %p218_p0, %p212_p11 }
  0x20   :  { %222 = shalt.err (!%p219_p1)
}
  0x21   :  { %s253_s0 = smov 64   ;;  %s254_s7 = smov 4  }
  0x22   :  { %32 = dma.hbm_to_vmem [thread:$0]  %s325_s1, 256, %s278_s15, [#allocation7], %s253_s0, %s253_s0, %s254_s7  }
  0x23   :  { %245 = dma.done.wait [#allocation4], 128  }
  0x24   :  { %246 = vsyncadd [#allocation4], 4294967168 }
  0x25   :  { %247 = dma.done.wait [#allocation7], 256  }
  0x26   :  { %248 = vsyncadd [#allocation7], 4294967040  ;;  %v255_v0 = vmov 0.0   ;;  %vm256_vm0 = vmmov 0   ;;  %v173_v1 = vld [vmem:[#allocation6] sm:$0xff]   ;;  %v174_v2 = vld [vmem:[#allocation6 + $0x8] sm:$0xff]  }
  0x27   :  { %158 = vmatprep.subr.bf16.mxu0 %v255_v0  ;;  %162 = vmatprep.mubr.msk.bf16.mxu0 %vm256_vm0, %v255_v0  ;;  %v48_v3 = vld [vmem:[#allocation3] sm:$0xff]  ;;  %vm66_vm1 = vcmask 261120   ;;  %s257_s1 = smov [#allocation8]  }
  0x28   :  { %159 = vmatpush3.bf16.msra.mxu0 %v173_v1  ;;  %v49_v4 = vpack.c.bf16 %v48_v3, %v48_v3  ;;  %v154_v5 = vld [vmem:[%s326_s2] ss:$0 sm:$0xff]  ;;  %s141_s12 = sshll.u32 %s257_s1, 4  ;;  %s142_s12 = int_to_ptr.vmem [resolvable:$true] %s141_s12 }
  0x29   :  { %160 = vmatprep.subr.bf16.mxu0 %v255_v0  ;;  %s223_s2 = scalar_lea.vmem %s142_s12, 128  ;;  %p228_p3 = scmp.lt.s32.totalorder %s142_s12, %s142_s12 }
  0x2a   :  { %p224_p2 = scmp.ne.s32.totalorder %s142_s12, %s223_s2  ;;  %p229_p4 = scmp.lt.s32.totalorder %s223_s2, %s223_s2 }
  0x2c   :  { %161 = vmatpush3.bf16.msra.mxu0 %v174_v2  ;;  %p230_p5 = por %p229_p4, %p228_p3 }
  0x2e   :  { %p231_p6 = pnand %p230_p5, %p224_p2 }
  0x2f   :  { %163 = vmatmul.mubr.msk.bf16.vlgmr.msra.gmra.mrb[0].mxu0 %vm66_vm1, %v49_v4 }
 0x102   :  { %v104_v6 = vpop.f32.mrb[0].mxu0 }
 0x103   :  { %v123_v7 = vadd.f32 %v154_v5, %v104_v6  ;;  %v164_v8 = vpop.f32.mrb[1].mxu0 }
 0x104   :  { %v107_v9 = vpop.f32.mrb[2].mxu0 }
 0x105   :  { %124 = vmax.xlane.f32.xlu0 %v123_v7  ;;  %v165_v10 = vpop.f32.mrb[3].mxu0 }
 0x192   :  { %v125_v11 = vpop.xlane.xlu0 %124 }
 0x193   :  { %v126_v12 = vsub.f32 %v123_v7, %v125_v11 }
 0x195   :  { %v127_v13 = vmul.f32 1.442695, %v126_v12 }
 0x197   :  { %175 = vpow2.f32 %v127_v13 }
 0x1a1   :  { %v176_v14 = vpop.eup %175 }
 0x1a2   :  { %129 = vadd.xlane.f32.xlu0 %v176_v14 }
 0x22f   :  { %v130_v15 = vpop.xlane.xlu0 %129 }
 0x230   :  { %177 = vlog2.f32 %v130_v15 }
 0x23a   :  { %v178_v16 = vpop.eup %177 }
 0x23b   :  { %v132_v17 = vmul.f32 0.6931472, %v178_v16 }
 0x23d   :  { %v133_v18 = vsub.f32 %v126_v12, %v132_v17 }
 0x23f   :  { %134 = vst [vmem:[#allocation8] sm:$0xff] %v133_v18 }
 0x240   :  { %234 = shalt.err (!%p231_p6)
}
 0x241   :  { %s235_s15 = scalar_lea.hbm %s327_s3, 128 }
 0x242   :  { %p236_p7 = scmp.ne.s32.totalorder %s327_s3, %s235_s15  ;;  %p239_p8 = scmp.lt.u32.totalorder %s235_s15, %s327_s3 }
 0x244   :  { %p241_p9 = pnand %p239_p8, %p236_p7 }
 0x246   :  { %244 = shalt.err (!%p241_p9)
}
 0x247   :  { %144 = dma.vmem_to_hbm [thread:$0]  %s142_s12, 128, %s327_s3, [#allocation5]  }
 0x248   :  { %249 = dma.done.wait [#allocation5], 128  }
 0x249   :  { %250 = vsyncadd [#allocation5], 4294967168 }
 0x24a   :  { %148 = vsyncpa [#allocation4], 1 }
 0x24b   :  { %149 = vsyncpa [#allocation7], 1 }
 0x24c   :  { %150 = vsyncpa [#allocation5], 1 }

</bundles_post_ra>
